<compile_context>
chip_gen: v7x
topology: tpu7x:2x2x1
jax: 0.10.0
libtpu: 0.0.40
codegen_flags: <defaults>
</compile_context>

<pallas_src>
import jax
import jax.numpy as jnp
from jax.experimental import pallas as pl
from jax.experimental.pallas import tpu as pltpu


def _dma_copy_kernel(a_ref, o_ref, sem):
    # Single direct HBM->HBM DMA of the full array: zero compute, no VMEM
    # staging, no per-grid-step overhead.
    cp = pltpu.make_async_copy(a_ref, o_ref, sem)
    cp.start()
    cp.wait()


def _materialized_copy(a):
    """HBM->HBM copy of `a` via one Pallas DMA (no VMEM round-trip)."""
    if a.size == 0:
        # Nothing to move; a fresh zero-sized buffer is free to construct.
        return jnp.zeros(a.shape, dtype=a.dtype)

    return pl.pallas_call(
        _dma_copy_kernel,
        out_shape=jax.ShapeDtypeStruct(a.shape, a.dtype),
        in_specs=[pl.BlockSpec(memory_space=pl.ANY)],
        out_specs=pl.BlockSpec(memory_space=pl.ANY),
        scratch_shapes=[pltpu.SemaphoreType.DMA(())],
    )(a)


# jit so that, when the copy path is used, dispatch overhead disappears and
# the pallas_call fuses cleanly into the surrounding program.
_materialized_copy_jit = jax.jit(_materialized_copy)


def my_module_forward(a, b, *, materialize_copy=False):
    """Equivalent of MyModule.forward(a, b) -> (a, empty float32 tensor).

    Default path returns `a` directly (the op is an identity — no kernel, no
    HBM traffic).  Set materialize_copy=True only if the caller requires a
    freshly materialized output buffer; that path runs a single direct
    HBM->HBM DMA Pallas kernel.
    """
    del b  # `b` is unused by the PyTorch module.

    # torch.tensor([]) is a float32 tensor of shape (0,).  A zero-sized array
    # has nothing to compute or move, so it is constructed directly in JAX.
    # TODO(synk): zero-sized outputs have no Pallas equivalent; built in plain JAX.
    empty = jnp.zeros((0,), dtype=jnp.float32)

    if not materialize_copy:
        return a, empty

    return _materialized_copy_jit(a), empty


if __name__ == "__main__":
    key = jax.random.PRNGKey(0)
    ka, kb = jax.random.split(key)

    # Small shapes consistent with the arbitrary (a, b) signature.
    a = jax.random.normal(ka, (2, 4, 16, 16), dtype=jnp.float32)
    b = jax.random.normal(kb, (2, 4, 16, 16), dtype=jnp.float32)

    # Fast (default) path: pure pass-through, no kernel launch.
    a_fast, empty_fast = my_module_forward(a, b)
    jax.block_until_ready(a_fast)
    jax.block_until_ready(empty_fast)
    assert a_fast.shape == a.shape and a_fast.dtype == a.dtype
    assert bool(jnp.all(a_fast == a))
    assert empty_fast.shape == (0,) and empty_fast.dtype == jnp.float32

    # Materialized-copy path: exercise the single-DMA Pallas kernel and verify.
    a_copy, empty_copy = my_module_forward(a, b, materialize_copy=True)
    jax.block_until_ready(a_copy)
    jax.block_until_ready(empty_copy)
    assert a_copy.shape == a.shape and a_copy.dtype == a.dtype
    assert bool(jnp.all(a_copy == a))
    assert empty_copy.shape == (0,) and empty_copy.dtype == jnp.float32

    print("KERNEL_OK")
</pallas_src>

<mosaic_0001>
module attributes {stable_mosaic.version = 11 : i64} {
  func.func @_dma_copy_kernel(%arg0: memref<2x4x16x16xf32, #tpu.memory_space<any>>, %arg1: memref<2x4x16x16xf32, #tpu.memory_space<any>>, %arg2: memref<!tpu.dma_semaphore, #tpu.memory_space<semaphore_mem>>) attributes {dimension_semantics = [], scalar_prefetch = 0 : i64, scratch_operands = 1 : i64, tpu.core_type = #tpu.core_type<tc>} {
    tpu.enqueue_dma source(%arg0 : memref<2x4x16x16xf32, #tpu.memory_space<any>>) target(%arg1 : memref<2x4x16x16xf32, #tpu.memory_space<any>>) target_semaphore(%arg2 : memref<!tpu.dma_semaphore, #tpu.memory_space<semaphore_mem>>)
    tpu.wait_dma2 semaphore(%arg2 : memref<!tpu.dma_semaphore, #tpu.memory_space<semaphore_mem>>) src(%arg0 : memref<2x4x16x16xf32, #tpu.memory_space<any>>) dst(%arg1 : memref<2x4x16x16xf32, #tpu.memory_space<any>>)
    return
  }
}

</mosaic_0001>

<bundles_post_ra>
// kernel: _materialized_copy.1
= control target key start
LH: loop header
LB: loop body
LE: loop exit
PB: predicated region body
PF: predicated region fallthrough
CT: control target
= control target key end

     0   :  { %s36_s6 = smov [#allocation2]   ;;  %s37_s7 = smov [#allocation3]   ;;  %s55_s0 = inlined_call_operand.hbm [shape: f32[2,4,16,16], index: 0, kind: input, shape index: {}]   ;;  %s56_s1 = inlined_call_operand.hbm [shape: f32[2,4,16,16], index: 1, kind: output, shape index: {}]  }
   0x1   :  { %s38_s8 = smov 0  }
   0x2   :  { %18 = dma.general %s55_s0, 2048, %s56_s1, %s36_s6, %s37_s7, [#allocation4], %s38_s8, 0  }
   0x3   :  { %34 = dma.done.wait [#allocation2], 2048 }
   0x4   :  { %35 = vsyncadd [#allocation2], 4294965248 }
   0x5   :  { %24 = vsyncmov [#allocation2] }
   0x8   :  { %s25_s13 = vpop.sfrf %24 }
   0x9   :  { %p30_p0 = scmp.ne.s32.totalorder %s25_s13, 0 }
   0xb   :  { %29 = shalt.err (%p30_p0)  }

</bundles_post_ra>
